<compile_context>
chip_gen: v7x
topology: tpu7x:2x2x1
jax: 0.10.0
libtpu: 0.0.40
codegen_flags: <defaults>
</compile_context>

<pallas_src>
import functools

import jax
import jax.numpy as jnp
from jax import lax
from jax.experimental import pallas as pl
from jax.experimental.pallas import tpu as pltpu

_LANE = 128


def _round_up(x, m):
    return ((x + m - 1) // m) * m


def _cdiv(a, b):
    return -(-a // b)


def _plan(nc, flat, itemsize, target_bytes):
    """Static tiling plan: images per DMA block / per inner chunk / core split."""
    flat_pad = _round_up(flat, _LANE)
    sub = 8 * max(1, 4 // max(1, itemsize))  # sublane pack: f32->8, bf16->16, i8->32

    # Images per inner-loop chunk: keep the ~3 live f32 temporaries (x, dh, dw)
    # within a ~48-vreg working set so nothing big spills to VMEM.
    chunk = max(sub, ((48 * 8 * _LANE) // (3 * flat_pad)) // sub * sub)
    chunk = min(chunk, 512)

    if nc <= chunk:
        return dict(tnc=nc, chunk=nc, n_chunks=1, ncores=1, nb_per_core=1,
                    ragged=False)

    # Images per grid step (DMA block): as close to target_bytes as possible.
    cap = (nc // chunk) * chunk
    tnc = max(chunk,
              min(cap, (target_bytes // (flat_pad * itemsize)) // chunk * chunk))
    # Prefer an exact divisor of nc (no ragged tail), but only within ~75% of
    # the target so awkward nc (e.g. prime) cannot collapse the block size.
    lo = max(chunk, (int(tnc * 0.75) // chunk) * chunk)
    for t in range(tnc, lo - 1, -chunk):
        if nc % t == 0:
            tnc = t
            break
    nb = _cdiv(nc, tnc)

    # Megacore (v7x): split the blocks across the two TensorCores.  Requires an
    # even block count so no block starts past the end of the array; only
    # accepted if blocks stay >= half the chosen size.  No-op on 1-TC chips.
    ncores = 1
    if nb >= 2:
        t = tnc
        while t > chunk and _cdiv(nc, t) % 2 != 0:
            t -= chunk
        if _cdiv(nc, t) % 2 == 0 and 2 * t >= tnc:
            tnc, ncores = t, 2
            nb = _cdiv(nc, tnc)

    return dict(tnc=tnc, chunk=chunk, n_chunks=tnc // chunk, ncores=ncores,
                nb_per_core=nb // ncores, ragged=(nc % tnc) != 0)


def _tv_kernel(x_ref, h_ref, w_ref, *, nc_total, tnc, chunk, n_chunks, flat,
               img_w, ragged):
    c = pl.program_id(0)   # TensorCore slot (outer, "parallel")
    i = pl.program_id(1)   # block index within this core ("arbitrary")

    @pl.when(i == 0)
    def _init():
        h_ref[...] = jnp.zeros_like(h_ref)
        w_ref[...] = jnp.zeros_like(w_ref)

    block_row0 = (c * pl.num_programs(1) + i) * tnc  # first image of this block

    def accum(x_chunk, row0):
        xs = x_chunk.astype(jnp.float32)                   # (chunk, flat)
        # Finite differences via lane rolls (XLU slot); shapes stay aligned.
        dh = pltpu.roll(xs, flat - img_w, axis=1) - xs     # x[p+W] - x[p]
        dw = pltpu.roll(xs, flat - 1, axis=1) - xs         # x[p+1] - x[p]
        dh2 = dh * dh
        dw2 = dw * dw
        if ragged:
            # Mask images past the logical end (undefined DMA tail).  Masking
            # the *squared* values means NaN/Inf garbage cannot leak.
            rows = row0 + lax.broadcasted_iota(jnp.int32, (xs.shape[0], 1), 0)
            keep = rows < nc_total
            dh2 = jnp.where(keep, dh2, 0.0)
            dw2 = jnp.where(keep, dw2, 0.0)
        # Reduce only over the sublane (image) axis; accumulators stay tiny
        # and lane-dense, resident in VMEM across the whole inner axis.
        h_ref[...] += jnp.sum(dh2, axis=0, keepdims=True)[None]
        w_ref[...] += jnp.sum(dw2, axis=0, keepdims=True)[None]

    if n_chunks == 1:
        accum(x_ref[...], block_row0)
    else:
        def body(k, carry):
            start = pl.multiple_of(k * chunk, chunk)
            accum(x_ref[pl.ds(start, chunk), :], block_row0 + start)
            return carry

        lax.fori_loop(0, n_chunks, body, 0,
                      unroll=True if n_chunks <= 8 else 4)


def _tv_loss_ref(x, tv_loss_weight=1.0):
    """Pure-JAX reference mirroring the PyTorch module."""
    N, C, H, W = x.shape
    xf = x.astype(jnp.float32)
    count_h = C * (H - 1) * W
    count_w = C * H * (W - 1)
    h_tv = jnp.sum((xf[:, :, 1:, :] - xf[:, :, : H - 1, :]) ** 2)
    w_tv = jnp.sum((xf[:, :, :, 1:] - xf[:, :, :, : W - 1]) ** 2)
    return tv_loss_weight * 2.0 * (h_tv / count_h + w_tv / count_w) / N


def tv_loss(x, tv_loss_weight=1.0, *, target_block_bytes=6 * 1024 * 1024,
            vmem_limit_bytes=48 * 1024 * 1024):
    """Total-variation loss matching PyTorch TVLoss.forward (NCHW input)."""
    N, C, H, W = x.shape
    nc, flat = N * C, H * W

    itemsize = jnp.dtype(x.dtype).itemsize
    flat_pad = _round_up(flat, _LANE)
    sub = 8 * max(1, 4 // max(1, itemsize))
    if nc == 0 or flat == 0 or 4 * sub * flat_pad * itemsize > vmem_limit_bytes:
        # TODO(synk): tile H (with a 1-row halo) for very large single images
        # instead of falling back to plain XLA.
        return _tv_loss_ref(x, tv_loss_weight)

    xf = x.reshape(nc, flat)  # free reshape (contiguous in HBM)
    p = _plan(nc, flat, itemsize, target_block_bytes)
    tnc, chunk, ncores, nbpc = p["tnc"], p["chunk"], p["ncores"], p["nb_per_core"]

    kernel = functools.partial(
        _tv_kernel, nc_total=nc, tnc=tnc, chunk=chunk, n_chunks=p["n_chunks"],
        flat=flat, img_w=W, ragged=p["ragged"])

    flops = 6 * nc * flat  # 2 subs + 2 muls + 2 accumulate-adds per element
    bytes_accessed = nc * flat * itemsize + 2 * ncores * flat * 4

    h_acc, w_acc = pl.pallas_call(
        kernel,
        out_shape=(
            jax.ShapeDtypeStruct((ncores, 1, flat), jnp.float32),
            jax.ShapeDtypeStruct((ncores, 1, flat), jnp.float32),
        ),
        grid=(ncores, nbpc),
        in_specs=[pl.BlockSpec((tnc, flat), lambda c, i: (c * nbpc + i, 0))],
        out_specs=(
            pl.BlockSpec((1, 1, flat), lambda c, i: (c, 0, 0)),
            pl.BlockSpec((1, 1, flat), lambda c, i: (c, 0, 0)),
        ),
        compiler_params=pltpu.CompilerParams(
            dimension_semantics=("parallel", "arbitrary"),
            vmem_limit_bytes=vmem_limit_bytes,
        ),
        cost_estimate=pl.CostEstimate(
            flops=flops, transcendentals=0, bytes_accessed=bytes_accessed),
    )(xf)

    # Tiny final reductions in plain XLA; the roll-wrap positions are dropped
    # here (last image row for the h-diff, last image column for the w-diff).
    h_vec = jnp.sum(h_acc, axis=(0, 1))                 # (H*W,)
    w_vec = jnp.sum(w_acc, axis=(0, 1))                 # (H*W,)
    h_tv = jnp.sum(h_vec[: (H - 1) * W])
    w_tv = jnp.sum(w_vec.reshape(H, W)[:, : W - 1])

    # Mirrors the PyTorch module exactly, including 0/0 -> nan when H==1/W==1.
    count_h = C * (H - 1) * W
    count_w = C * H * (W - 1)
    return tv_loss_weight * 2.0 * (h_tv / count_h + w_tv / count_w) / N


if __name__ == "__main__":
    key = jax.random.PRNGKey(0)
    cases = [
        # (shape, dtype, kwargs)
        ((2, 4, 16, 16), jnp.float32, {}),                       # single-block path
        ((16, 16, 16, 16), jnp.float32,                          # multi-chunk loop + 2 core slots
         dict(target_block_bytes=128 * 1024)),
        ((5, 25, 16, 16), jnp.float32,                           # ragged tail + validity mask
         dict(target_block_bytes=32 * 1024)),
        ((2, 4, 16, 16), jnp.bfloat16, {}),                      # low-precision input
    ]
    for idx, (shape, dtype, kwargs) in enumerate(cases):
        key, k = jax.random.split(key)
        x = jax.random.normal(k, shape, dtype=jnp.float32).astype(dtype)
        out = jax.block_until_ready(tv_loss(x, tv_loss_weight=1.0, **kwargs))
        ref = jax.block_until_ready(_tv_loss_ref(x, tv_loss_weight=1.0))
        assert jnp.allclose(out, ref, rtol=1e-4, atol=1e-5), (idx, out, ref)
    print("KERNEL_OK")
</pallas_src>

<mosaic_0001>
module attributes {stable_mosaic.version = 11 : i64} {
  func.func @_tv_kernel(%arg0: i32, %arg1: i32, %arg2: memref<8x256xf32, #tpu.memory_space<vmem>>, %arg3: memref<1x1x256xf32, #tpu.memory_space<vmem>>, %arg4: memref<1x1x256xf32, #tpu.memory_space<vmem>>) attributes {dimension_semantics = [#tpu.dimension_semantics<parallel>, #tpu.dimension_semantics<arbitrary>], iteration_bounds = array<i64: 1, 1>, scalar_prefetch = 0 : i64, scratch_operands = 0 : i64, tpu.core_type = #tpu.core_type<tc>, window_params = [{transform_indices = @transform_0, window_bounds = array<i64: 8, 256>}, {transform_indices = @transform_1, window_bounds = array<i64: 1, 1, 256>}, {transform_indices = @transform_2, window_bounds = array<i64: 1, 1, 256>}]} {
    %c0_i32 = arith.constant 0 : i32
    %0 = arith.cmpi eq, %arg1, %c0_i32 : i32
    %1 = arith.extui %0 : i1 to i32
    %c0_i32_0 = arith.constant 0 : i32
    %2 = arith.cmpi ne, %1, %c0_i32_0 : i32
    scf.if %2 {
      %cst_15 = arith.constant 0.000000e+00 : f32
      %22 = vector.broadcast %cst_15 : f32 to vector<1x1x256xf32>
      %c0_16 = arith.constant 0 : index
      %c0_17 = arith.constant 0 : index
      %c0_18 = arith.constant 0 : index
      %23 = vector.load %arg3[%c0_16, %c0_17, %c0_18] : memref<1x1x256xf32, #tpu.memory_space<vmem>>, vector<1x1x256xf32>
      tpu.vector_store %arg3[%c0_16, %c0_17, %c0_18], %22 {strides = array<i32>} : memref<1x1x256xf32, #tpu.memory_space<vmem>>, vector<1x1x256xf32>,
      %cst_19 = arith.constant 0.000000e+00 : f32
      %24 = vector.broadcast %cst_19 : f32 to vector<1x1x256xf32>
      %c0_20 = arith.constant 0 : index
      %c0_21 = arith.constant 0 : index
      %c0_22 = arith.constant 0 : index
      %25 = vector.load %arg4[%c0_20, %c0_21, %c0_22] : memref<1x1x256xf32, #tpu.memory_space<vmem>>, vector<1x1x256xf32>
      tpu.vector_store %arg4[%c0_20, %c0_21, %c0_22], %24 {strides = array<i32>} : memref<1x1x256xf32, #tpu.memory_space<vmem>>, vector<1x1x256xf32>,
    } else {
    }
    %c0 = arith.constant 0 : index
    %c0_1 = arith.constant 0 : index
    %3 = vector.load %arg2[%c0, %c0_1] : memref<8x256xf32, #tpu.memory_space<vmem>>, vector<8x256xf32>
    %c240_i32 = arith.constant 240 : i32
    %4 = tpu.dynamic_rotate %3 by %c240_i32 dim 1 : vector<8x256xf32>, i32 -> vector<8x256xf32>
    %5 = arith.subf %4, %3 : vector<8x256xf32>
    %c255_i32 = arith.constant 255 : i32
    %6 = tpu.dynamic_rotate %3 by %c255_i32 dim 1 : vector<8x256xf32>, i32 -> vector<8x256xf32>
    %7 = arith.subf %6, %3 : vector<8x256xf32>
    %8 = arith.mulf %5, %5 : vector<8x256xf32>
    %9 = arith.mulf %7, %7 : vector<8x256xf32>
    %c0_2 = arith.constant 0 : index
    %c0_3 = arith.constant 0 : index
    %c0_4 = arith.constant 0 : index
    %10 = vector.load %arg3[%c0_2, %c0_3, %c0_4] : memref<1x1x256xf32, #tpu.memory_space<vmem>>, vector<1x1x256xf32>
    %cst = arith.constant dense<0.000000e+00> : vector<256xf32>
    %11 = vector.multi_reduction <add>, %8, %cst [0] : vector<8x256xf32> to vector<256xf32>
    %12 = vector.shape_cast %11 : vector<256xf32> to vector<1x256xf32>
    %13 = vector.shape_cast %12 : vector<1x256xf32> to vector<1x1x256xf32>
    %14 = arith.addf %10, %13 : vector<1x1x256xf32>
    %c0_5 = arith.constant 0 : index
    %c0_6 = arith.constant 0 : index
    %c0_7 = arith.constant 0 : index
    %15 = vector.load %arg3[%c0_5, %c0_6, %c0_7] : memref<1x1x256xf32, #tpu.memory_space<vmem>>, vector<1x1x256xf32>
    tpu.vector_store %arg3[%c0_5, %c0_6, %c0_7], %14 {strides = array<i32>} : memref<1x1x256xf32, #tpu.memory_space<vmem>>, vector<1x1x256xf32>,
    %c0_8 = arith.constant 0 : index
    %c0_9 = arith.constant 0 : index
    %c0_10 = arith.constant 0 : index
    %16 = vector.load %arg4[%c0_8, %c0_9, %c0_10] : memref<1x1x256xf32, #tpu.memory_space<vmem>>, vector<1x1x256xf32>
    %cst_11 = arith.constant dense<0.000000e+00> : vector<256xf32>
    %17 = vector.multi_reduction <add>, %9, %cst_11 [0] : vector<8x256xf32> to vector<256xf32>
    %18 = vector.shape_cast %17 : vector<256xf32> to vector<1x256xf32>
    %19 = vector.shape_cast %18 : vector<1x256xf32> to vector<1x1x256xf32>
    %20 = arith.addf %16, %19 : vector<1x1x256xf32>
    %c0_12 = arith.constant 0 : index
    %c0_13 = arith.constant 0 : index
    %c0_14 = arith.constant 0 : index
    %21 = vector.load %arg4[%c0_12, %c0_13, %c0_14] : memref<1x1x256xf32, #tpu.memory_space<vmem>>, vector<1x1x256xf32>
    tpu.vector_store %arg4[%c0_12, %c0_13, %c0_14], %20 {strides = array<i32>} : memref<1x1x256xf32, #tpu.memory_space<vmem>>, vector<1x1x256xf32>,
    return
  }
  func.func @transform_0(%arg0: i32, %arg1: i32) -> (i32, i32) {
    %c1_i32 = arith.constant 1 : i32
    %0 = arith.muli %arg0, %c1_i32 : i32
    %1 = arith.addi %0, %arg1 : i32
    %c0_i32 = arith.constant 0 : i32
    %c0_i32_0 = arith.constant 0 : i32
    return %1, %c0_i32 : i32, i32
  }
  func.func @transform_1(%arg0: i32, %arg1: i32) -> (i32, i32, i32) {
    %c0_i32 = arith.constant 0 : i32
    %c0_i32_0 = arith.constant 0 : i32
    %c0_i32_1 = arith.constant 0 : i32
    return %arg0, %c0_i32, %c0_i32_0 : i32, i32, i32
  }
  func.func @transform_2(%arg0: i32, %arg1: i32) -> (i32, i32, i32) {
    %c0_i32 = arith.constant 0 : i32
    %c0_i32_0 = arith.constant 0 : i32
    %c0_i32_1 = arith.constant 0 : i32
    return %arg0, %c0_i32, %c0_i32_0 : i32, i32, i32
  }
}

</mosaic_0001>

<bundles_post_ra>
// kernel: tpu_custom_call.1
= control target key start
LH: loop header
LB: loop body
LE: loop exit
PB: predicated region body
PF: predicated region fallthrough
CT: control target
= control target key end

     0   :  { %8 = vsyncpa [#allocation3], 0  ;;  %s313_s0 = inlined_call_operand.hbm [shape: f32[8,256], index: 0, kind: input, shape index: {}]   ;;  %s314_s1 = inlined_call_operand.hbm [shape: f32[1,1,256], index: 1, kind: output, shape index: {0}]   ;;  %s315_s2 = inlined_call_operand.hbm [shape: f32[1,1,256], index: 2, kind: output, shape index: {1}]  }
   0x1   :  { %9 = vsyncpa [#allocation4], 0 }
   0x2   :  { %10 = vsyncpa [#allocation7], 0  ;;  %s243_s9 = smov [#allocation2]   ;;  %s171_s13 = scalar_lea.hbm %s313_s0, 256 }
   0x3   :  { %s21_s10 = sshll.u32 %s243_s9, 4  ;;  %p172_p0 = scmp.ne.s32.totalorder %s313_s0, %s171_s13  ;;  %s22_s10 = int_to_ptr.vmem [resolvable:$true] %s21_s10 }
   0x4   :  { %p175_p1 = scmp.lt.u32.totalorder %s171_s13, %s313_s0 }
   0x6   :  { %p177_p2 = pnand %p175_p1, %p172_p0 }
   0x8   :  { %180 = shalt.err (!%p177_p2)
}
   0x9   :  { %s181_s18 = scalar_lea.vmem %s22_s10, 256  ;;  %p186_p4 = scmp.lt.s32.totalorder %s22_s10, %s22_s10 }
   0xa   :  { %p182_p3 = scmp.ne.s32.totalorder %s22_s10, %s181_s18  ;;  %p187_p5 = scmp.lt.s32.totalorder %s181_s18, %s181_s18 }
   0xc   :  { %p188_p6 = por %p187_p5, %p186_p4 }
   0xe   :  { %p189_p7 = pnand %p188_p6, %p182_p3 }
  0x10   :  { %192 = shalt.err (!%p189_p7)
}
  0x11   :  { %24 = dma.hbm_to_vmem [thread:$0]  %s313_s0, 256, %s22_s10, [#allocation3]  }
  0x12   :  { %237 = dma.done.wait [#allocation3], 256  }
  0x13   :  { %238 = vsyncadd [#allocation3], 4294967040  ;;  %v39_v0 = vld [vmem:[#allocation2] sm:$0xff]  ;;  %s244_s21 = smov 127   ;;  %s245_s22 = smov 112   ;;  %v40_v1 = vld [vmem:[#allocation2 + $0x8] sm:$0xff]  ;;  %v33_v2 = vlaneseq }
  0x14   :  { %52 = vrot.lane.b32.xlu1 %v39_v0, %s244_s21  ;;  %41 = vrot.lane.b32.xlu0 %v39_v0, %s245_s22  ;;  %v246_v4 = vmov 0.0   ;;  %v247_v26 = vmov 1966171168   ;;  %s248_s0 = smov [#allocation5]   ;;  %s249_s24 = smov [#allocation6]  }
  0x15   :  { %vm277_vm0 = vcmp.lt.s32.totalorder %v33_v2, 256  ;;  %v46_v5 = vand.u32 127, %v33_v2  ;;  %v82_v27 = vunpack.c.l.s4 %v247_v26  ;;  %v85_v37 = vshrl.u32 %v33_v2, 7  ;;  %s141_s23 = sshll.u32 %s248_s0, 4  ;;  %s151_s25 = sshll.u32 %s249_s24, 4  ;;  %s142_s23 = int_to_ptr.vmem [resolvable:$true] %s141_s23  ;;  %s152_s25 = int_to_ptr.vmem [resolvable:$true] %s151_s25 }
  0x16   :  { %37 = vst.msk [vmem:[#allocation5] sm:$0x3] %vm277_vm0, %v246_v4  ;;  %38 = vst.msk [vmem:[#allocation6] sm:$0x3] %vm277_vm0, %v246_v4  ;;  %s193_s26 = scalar_lea.vmem %s142_s23, 32  ;;  %p198_p9 = scmp.lt.s32.totalorder %s142_s23, %s142_s23 }
  0x17   :  { %vm56_vm1 = vcmp.lt.s32.totalorder %v46_v5, 127  ;;  %vm47_vm2 = vcmp.lt.s32.totalorder %v46_v5, 112  ;;  %v83_v36 = vunpack.c.0.s8 %v82_v27  ;;  %p194_p8 = scmp.ne.s32.totalorder %s142_s23, %s193_s26  ;;  %p199_p10 = scmp.lt.s32.totalorder %s193_s26, %s193_s26 }
  0x18   :  { %54 = vrot.lane.b32.xlu1 %v40_v1, %s244_s21  ;;  %43 = vrot.lane.b32.xlu0 %v40_v1, %s245_s22 }
  0x19   :  { %v86_v46 = vsub.s32 %v83_v36, %v85_v37  ;;  %p200_p11 = por %p199_p10, %p198_p9 }
  0x1b   :  { %p201_p12 = pnand %p200_p11, %p194_p8 }
  0x1d   :  { %v65_v55 = vld [vmem:[#allocation5] sm:$0x3]  ;;  %v102_v56 = vld [vmem:[#allocation6] sm:$0x3] }
  0x86   :  { %v53_v6 = vpop.permute.xlu1 %52  ;;  %v42_v7 = vpop.permute.xlu0 %41 }
  0x8a   :  { %v55_v8 = vpop.permute.xlu1 %54  ;;  %v44_v9 = vpop.permute.xlu0 %43 }
  0x8b   :  { %v57_v10 = vsel %vm56_vm1, %v53_v6, %v55_v8  ;;  %v58_v11 = vsel %vm56_vm1, %v55_v8, %v53_v6  ;;  %v48_v12 = vsel %vm47_vm2, %v42_v7, %v44_v9  ;;  %v49_v13 = vsel %vm47_vm2, %v44_v9, %v42_v7 }
  0x8c   :  { %v59_v14 = vsub.f32 %v57_v10, %v39_v0  ;;  %v60_v15 = vsub.f32 %v58_v11, %v40_v1  ;;  %v50_v16 = vsub.f32 %v48_v12, %v39_v0  ;;  %v51_v17 = vsub.f32 %v49_v13, %v40_v1 }
  0x8e   :  { %v63_v18 = vmul.f32 %v59_v14, %v59_v14  ;;  %v64_v19 = vmul.f32 %v60_v15, %v60_v15  ;;  %v61_v20 = vmul.f32 %v50_v16, %v50_v16  ;;  %v62_v21 = vmul.f32 %v51_v17, %v51_v17 }
  0x90   :  { %v103_v22 = vrot.slane %v63_v18, 4  ;;  %v109_v23 = vrot.slane %v64_v19, 4  ;;  %v66_v24 = vrot.slane %v61_v20, 4  ;;  %v72_v25 = vrot.slane %v62_v21, 4 }
  0x92   :  { %v104_v28 = vadd.f32 %v103_v22, %v63_v18  ;;  %v110_v29 = vadd.f32 %v109_v23, %v64_v19  ;;  %v67_v30 = vadd.f32 %v66_v24, %v61_v20  ;;  %v73_v31 = vadd.f32 %v72_v25, %v62_v21 }
  0x94   :  { %v105_v32 = vrot.slane %v104_v28, 2  ;;  %v111_v33 = vrot.slane %v110_v29, 2  ;;  %v68_v34 = vrot.slane %v67_v30, 2  ;;  %v74_v35 = vrot.slane %v73_v31, 2 }
  0x96   :  { %v106_v38 = vadd.f32 %v105_v32, %v104_v28  ;;  %v112_v39 = vadd.f32 %v111_v33, %v110_v29  ;;  %v69_v40 = vadd.f32 %v68_v34, %v67_v30  ;;  %v75_v41 = vadd.f32 %v74_v35, %v73_v31 }
  0x98   :  { %v107_v42 = vrot.slane %v106_v38, 1  ;;  %v113_v43 = vrot.slane %v112_v39, 1  ;;  %v70_v44 = vrot.slane %v69_v40, 1  ;;  %v76_v45 = vrot.slane %v75_v41, 1 }
  0x9a   :  { %v108_v47 = vadd.f32 %v107_v42, %v106_v38  ;;  %v114_v48 = vadd.f32 %v113_v43, %v112_v39  ;;  %v71_v49 = vadd.f32 %v70_v44, %v69_v40  ;;  %v77_v50 = vadd.f32 %v76_v45, %v75_v41 }
  0x9c   :  { %v117_v51 = vcombine.low %v108_v47, %v114_v48  ;;  %v80_v52 = vcombine.low %v71_v49, %v77_v50 }
  0x9e   :  { %v87_v53 = vrot.slane %v80_v52, %v86_v46  ;;  %v124_v54 = vrot.slane %v117_v51, %v86_v46 }
  0xa0   :  { %v94_v57 = vrot.slane %v87_v53, %v86_v46  ;;  %v131_v58 = vrot.slane %v124_v54, %v86_v46 }
  0xa2   :  { %v96_v59 = vadd.f32 %v94_v57, %v65_v55  ;;  %v133_v60 = vadd.f32 %v131_v58, %v102_v56 }
  0xa4   :  { %101 = vst.msk [vmem:[#allocation5] sm:$0x3] %vm277_vm0, %v96_v59  ;;  %134 = vst.msk [vmem:[#allocation6] sm:$0x3] %vm277_vm0, %v133_v60 }
  0xa5   :  { %204 = shalt.err (!%p201_p12)
}
  0xa6   :  { %s205_s29 = scalar_lea.hbm %s314_s1, 32 }
  0xa7   :  { %p206_p13 = scmp.ne.s32.totalorder %s314_s1, %s205_s29  ;;  %p209_p0 = scmp.lt.u32.totalorder %s205_s29, %s314_s1 }
  0xa9   :  { %p211_p1 = pnand %p209_p0, %p206_p13 }
  0xab   :  { %214 = shalt.err (!%p211_p1)
}
  0xac   :  { %144 = dma.vmem_to_hbm [thread:$0]  %s142_s23, 32, %s314_s1, [#allocation4]  }
  0xad   :  { %s215_s8 = scalar_lea.vmem %s152_s25, 32  ;;  %p220_p3 = scmp.lt.s32.totalorder %s152_s25, %s152_s25 }
  0xae   :  { %p216_p2 = scmp.ne.s32.totalorder %s152_s25, %s215_s8  ;;  %p221_p4 = scmp.lt.s32.totalorder %s215_s8, %s215_s8 }
  0xb0   :  { %p222_p5 = por %p221_p4, %p220_p3 }
  0xb2   :  { %p223_p6 = pnand %p222_p5, %p216_p2 }
  0xb4   :  { %226 = shalt.err (!%p223_p6)
}
  0xb5   :  { %s227_s11 = scalar_lea.hbm %s315_s2, 32 }
  0xb6   :  { %p228_p7 = scmp.ne.s32.totalorder %s315_s2, %s227_s11  ;;  %p231_p8 = scmp.lt.u32.totalorder %s227_s11, %s315_s2 }
  0xb8   :  { %p233_p9 = pnand %p231_p8, %p228_p7 }
  0xba   :  { %236 = shalt.err (!%p233_p9)
}
  0xbb   :  { %154 = dma.vmem_to_hbm [thread:$0]  %s152_s25, 32, %s315_s2, [#allocation7]  }
  0xbc   :  { %239 = dma.done.wait [#allocation4], 32  }
  0xbd   :  { %240 = vsyncadd [#allocation4], 4294967264 }
  0xbe   :  { %241 = dma.done.wait [#allocation7], 32  }
  0xbf   :  { %242 = vsyncadd [#allocation7], 4294967264 }
  0xc0   :  { %161 = vsyncpa [#allocation3], 1 }
  0xc1   :  { %162 = vsyncpa [#allocation4], 1 }
  0xc2   :  { %163 = vsyncpa [#allocation7], 1 }

</bundles_post_ra>
